<compile_context>
chip_gen: v6e
topology: v6e:2x2x1
jax: 0.10.0
libtpu: 0.0.40
codegen_flags: <defaults>
</compile_context>

<pallas_src>
import functools

import numpy as np

import jax
import jax.numpy as jnp
from jax.experimental import pallas as pl
from jax.experimental.pallas import tpu as pltpu

_FOLD_LANES = 512          # target super-row width for the small-W (folded) path
_CHUNK = 256               # lane chunk for the wide-W path (-> 128 output lanes)


# ----------------------------------------------------------------------------
# Hardware-aware sizing helpers
# ----------------------------------------------------------------------------
def _sublane_multiple(dtype):
    # Sublane granularity is dtype dependent: 8 (f32), 16 (bf16), 32 (int8/fp8).
    return {4: 8, 2: 16, 1: 32}.get(jnp.dtype(dtype).itemsize, 8)


def _round_up(a, b):
    return (a + b - 1) // b * b


def _vmem_budget():
    """(vmem_limit_bytes, per-step input-block byte target), generation aware."""
    try:
        cap = int(pltpu.get_tpu_info().vmem_capacity_bytes)
    except Exception:
        cap = 64 * 1024 * 1024                      # conservative (v7x-sized) fallback
    vmem_limit = min(cap // 2, 64 * 1024 * 1024)    # 64 MiB on v5e/v6e, 32 MiB on v7x
    # Working set ~ 4-5x the input block (double-buffered in+out, f32 temps).
    block_target = max(2 << 20, min(cap // 10, 12 << 20))
    return vmem_limit, block_target


def _pick_tm(m_rows, row_bytes, sub, target_bytes):
    """Rows per block: as large as the VMEM target allows, sublane-aligned,
    with a mild preference for an even grid length (v7x: 2 TensorCores)."""
    if m_rows * row_bytes <= target_bytes:
        return m_rows                               # single (full) block
    tm = max(sub, (target_bytes // max(row_bytes, 1)) // sub * sub)
    tm = min(tm, m_rows)
    grid = pl.cdiv(m_rows, tm)
    if grid > 1 and grid % 2 == 1:
        tm2 = max(sub, _round_up(pl.cdiv(m_rows, grid + 1), sub))
        if tm2 <= tm and pl.cdiv(m_rows, tm2) % 2 == 0:
            tm = tm2
    return tm


# ----------------------------------------------------------------------------
# Constant selector matrices (built once on host; become compile-time consts)
# ----------------------------------------------------------------------------
def _split_selectors(chunk, dtype):
    """Column-pair operators for one `chunk`-wide lane chunk of a row half."""
    r = np.arange(chunk)[:, None]
    c = np.arange(chunk // 2)[None, :]
    c_ll = np.where(r // 2 == c, 0.25, 0.0)         # column pair-sum * 1/4
    c_ee = np.where(r == 2 * c, 1.0, 0.0)           # even-column selector
    return jnp.asarray(c_ll, dtype=dtype), jnp.asarray(c_ee, dtype=dtype)


def _fold_selectors(width, fold, dtype):
    """Block-diagonal operators acting on a super-row of `fold` packed
    [even|odd] row-pairs (width 2*width each)."""
    g = fold * 2 * width
    ow = fold * (width // 2)
    rows = np.arange(g)[:, None]
    cols = np.arange(ow)[None, :]
    j_r, p_r = rows // (2 * width), rows % (2 * width)
    half, q_r = p_r // width, p_r % width           # 0 = even source row, 1 = odd
    j_c, q_c = cols // (width // 2), cols % (width // 2)
    same = j_r == j_c
    pair = same & (q_r // 2 == q_c)                 # the 2x2 quad feeding (i, q_c)
    even = same & (half == 0) & (q_r == 2 * q_c)    # x[2i, 2j] selector
    s_ll = np.where(pair, 0.25, 0.0)
    s_hf = np.where(even, 1.0, 0.0) - s_ll          # lh+hl+hh == x[::2,::2] - ll
    return jnp.asarray(s_ll, dtype=dtype), jnp.asarray(s_hf, dtype=dtype)


# ----------------------------------------------------------------------------
# Kernels
# ----------------------------------------------------------------------------
def _haar_fold_kernel(x_ref, sll_ref, shf_ref, ll_ref, hf_ref):
    # x_ref: (TM, fold*2W) super-rows; selectors are constant VMEM-resident inputs.
    x = x_ref[...]
    ll = jnp.dot(x, sll_ref[...], preferred_element_type=jnp.float32)
    hf = jnp.dot(x, shf_ref[...], preferred_element_type=jnp.float32)
    ll_ref[...] = ll.astype(ll_ref.dtype)
    hf_ref[...] = hf.astype(hf_ref.dtype)


def _haar_split_kernel(x_ref, cll_ref, cee_ref, ll_ref, hf_ref, *, width, chunk):
    # x_ref: (TM, 2*width), each row = [even_row | odd_row] of one plane.
    cll = cll_ref[...]
    cee = cee_ref[...]
    half = chunk // 2
    for j in range(width // chunk):                 # static, lane-aligned chunks
        lo = j * chunk
        xe = x_ref[:, lo:lo + chunk]                # even source rows (ref slice)
        xo = x_ref[:, width + lo:width + lo + chunk]  # odd source rows
        s = xe + xo                                 # row pair-sum on the VPU
        ll = jnp.dot(s, cll, preferred_element_type=jnp.float32)
        xee = jnp.dot(xe, cee, preferred_element_type=jnp.float32)
        olo = j * half
        ll_ref[:, olo:olo + half] = ll.astype(ll_ref.dtype)
        hf_ref[:, olo:olo + half] = (xee - ll).astype(hf_ref.dtype)


# ----------------------------------------------------------------------------
# Public wrapper
# ----------------------------------------------------------------------------
def haar_wavelet_transform(x):
    """x: (B, C, H, W) float array (NCHW). Returns (low_freq, high_freq),
    each of shape (B, C, H//2, W//2)."""
    B, C, H, W = x.shape
    assert H % 2 == 0 and W % 2 == 0, "Height and width must be even for Haar transform"
    assert jnp.issubdtype(x.dtype, jnp.floating), "Haar transform requires a float dtype"

    dt = x.dtype
    itemsize = jnp.dtype(dt).itemsize
    sub = _sublane_multiple(dt)
    M = B * C * (H // 2)                            # one output row per row-pair
    vmem_limit, block_target = _vmem_budget()

    # --- path selection: fold small-W row-pairs for lane-dense stores --------
    fold = 1
    if W < 256:
        cand = min(max(_FOLD_LANES // (2 * W), 1), M)
        while cand > 1 and M % cand:
            cand -= 1
        fold = cand

    if fold > 1:
        # ---- folded path (small W): two dense matmuls per block ----
        G = fold * 2 * W
        OW = fold * (W // 2)
        m_rows = M // fold
        x2 = x.reshape(m_rows, G)                   # free contiguous reshape
        s_ll, s_hf = _fold_selectors(W, fold, dt)
        tm = _pick_tm(m_rows, G * itemsize, sub, block_target)
        kernel = _haar_fold_kernel
        operands = (x2, s_ll, s_hf)
        in_specs = [
            pl.BlockSpec((tm, G), lambda i: (i, 0)),
            pl.BlockSpec(s_ll.shape, lambda i: (0, 0)),   # fetched once, reused
            pl.BlockSpec(s_hf.shape, lambda i: (0, 0)),
        ]
        out_w = OW
        flops = 2 * 2 * m_rows * OW * G
    else:
        # ---- split path (wide W): VPU row-pair sum + chunked MXU column pair ----
        chunk = _CHUNK if (W % _CHUNK == 0 and W > _CHUNK) else W
        m_rows = M
        x2 = x.reshape(M, 2 * W)                    # free contiguous reshape
        c_ll, c_ee = _split_selectors(chunk, dt)
        tm = _pick_tm(M, 2 * W * itemsize, sub, block_target)
        kernel = functools.partial(_haar_split_kernel, width=W, chunk=chunk)
        operands = (x2, c_ll, c_ee)
        in_specs = [
            pl.BlockSpec((tm, 2 * W), lambda i: (i, 0)),
            pl.BlockSpec(c_ll.shape, lambda i: (0, 0)),   # fetched once, reused
            pl.BlockSpec(c_ee.shape, lambda i: (0, 0)),
        ]
        out_w = W // 2
        flops = 2 * 2 * M * (W // 2) * chunk

    grid = (pl.cdiv(m_rows, tm),)
    out_specs = [
        pl.BlockSpec((tm, out_w), lambda i: (i, 0)),
        pl.BlockSpec((tm, out_w), lambda i: (i, 0)),
    ]
    out_shape = (
        jax.ShapeDtypeStruct((m_rows, out_w), dt),
        jax.ShapeDtypeStruct((m_rows, out_w), dt),
    )
    bytes_accessed = (2 * W + 2 * (W // 2)) * M * itemsize

    ll, hf = pl.pallas_call(
        kernel,
        out_shape=out_shape,
        grid=grid,
        in_specs=in_specs,
        out_specs=out_specs,
        compiler_params=pltpu.CompilerParams(
            dimension_semantics=("parallel",),
            vmem_limit_bytes=vmem_limit,
        ),
        cost_estimate=pl.CostEstimate(
            flops=flops, transcendentals=0, bytes_accessed=bytes_accessed
        ),
    )(*operands)

    return (
        ll.reshape(B, C, H // 2, W // 2),
        hf.reshape(B, C, H // 2, W // 2),
    )


# ----------------------------------------------------------------------------
# Reference & self-test
# ----------------------------------------------------------------------------
def _reference(x):
    # Pure-JAX mirror of the PyTorch forward.
    low_pass = (x[:, :, ::2, :] + x[:, :, 1::2, :]) / 2
    high_pass = (x[:, :, ::2, :] - x[:, :, 1::2, :]) / 2
    ll = (low_pass[:, :, :, ::2] + low_pass[:, :, :, 1::2]) / 2
    lh = (low_pass[:, :, :, ::2] - low_pass[:, :, :, 1::2]) / 2
    hl = (high_pass[:, :, :, ::2] + high_pass[:, :, :, 1::2]) / 2
    hh = (high_pass[:, :, :, ::2] - high_pass[:, :, :, 1::2]) / 2
    return ll, lh + hl + hh


def _check(x):
    low, high = haar_wavelet_transform(x)
    jax.block_until_ready((low, high))
    ll_ref, hf_ref = _reference(x)
    assert low.shape == ll_ref.shape and high.shape == hf_ref.shape
    assert jnp.allclose(low, ll_ref, atol=1e-5, rtol=1e-5)
    assert jnp.allclose(high, hf_ref, atol=1e-5, rtol=1e-5)


if __name__ == "__main__":
    key = jax.random.PRNGKey(0)
    k0, k1 = jax.random.split(key)

    # Primary shape implied by the module (NCHW feature map) -> folded path.
    x_small = jax.random.normal(k0, (2, 4, 16, 16), dtype=jnp.float32)
    _check(x_small)

    # Wide feature map -> split path with 256->128 lane-chunked matmuls.
    x_wide = jax.random.normal(k1, (1, 2, 8, 512), dtype=jnp.float32)
    _check(x_wide)

    print("KERNEL_OK")
</pallas_src>

<mosaic_0001>
module attributes {stable_mosaic.version = 11 : i64} {
  func.func @_haar_fold_kernel(%arg0: i32, %arg1: memref<4x512xf32, #tpu.memory_space<vmem>>, %arg2: memref<512x128xf32, #tpu.memory_space<vmem>>, %arg3: memref<512x128xf32, #tpu.memory_space<vmem>>, %arg4: memref<4x128xf32, #tpu.memory_space<vmem>>, %arg5: memref<4x128xf32, #tpu.memory_space<vmem>>) attributes {dimension_semantics = [#tpu.dimension_semantics<parallel>], iteration_bounds = array<i64: 1>, scalar_prefetch = 0 : i64, scratch_operands = 0 : i64, tpu.core_type = #tpu.core_type<tc>, window_params = [{transform_indices = @transform_0, window_bounds = array<i64: 4, 512>}, {pipeline_mode = #tpu.pipeline_mode<synchronous>, transform_indices = @transform_1, window_bounds = array<i64: 512, 128>}, {pipeline_mode = #tpu.pipeline_mode<synchronous>, transform_indices = @transform_2, window_bounds = array<i64: 512, 128>}, {transform_indices = @transform_3, window_bounds = array<i64: 4, 128>}, {transform_indices = @transform_4, window_bounds = array<i64: 4, 128>}]} {
    %c0 = arith.constant 0 : index
    %c0_0 = arith.constant 0 : index
    %0 = vector.load %arg1[%c0, %c0_0] : memref<4x512xf32, #tpu.memory_space<vmem>>, vector<4x512xf32>
    %c0_1 = arith.constant 0 : index
    %c0_2 = arith.constant 0 : index
    %1 = vector.load %arg2[%c0_1, %c0_2] : memref<512x128xf32, #tpu.memory_space<vmem>>, vector<512x128xf32>
    %cst = arith.constant dense<0.000000e+00> : vector<4x128xf32>
    %2 = tpu.matmul %0, %1, %cst {dimension_numbers = #tpu.dot_dimension_numbers<[1], [0], [0], [1], [0, 0, 1, 1], [], []>} : vector<4x512xf32>, vector<512x128xf32>, vector<4x128xf32> -> vector<4x128xf32>
    %c0_3 = arith.constant 0 : index
    %c0_4 = arith.constant 0 : index
    %3 = vector.load %arg3[%c0_3, %c0_4] : memref<512x128xf32, #tpu.memory_space<vmem>>, vector<512x128xf32>
    %cst_5 = arith.constant dense<0.000000e+00> : vector<4x128xf32>
    %4 = tpu.matmul %0, %3, %cst_5 {dimension_numbers = #tpu.dot_dimension_numbers<[1], [0], [0], [1], [0, 0, 1, 1], [], []>} : vector<4x512xf32>, vector<512x128xf32>, vector<4x128xf32> -> vector<4x128xf32>
    %c0_6 = arith.constant 0 : index
    %c0_7 = arith.constant 0 : index
    %5 = vector.load %arg4[%c0_6, %c0_7] : memref<4x128xf32, #tpu.memory_space<vmem>>, vector<4x128xf32>
    tpu.vector_store %arg4[%c0_6, %c0_7], %2 {strides = array<i32>} : memref<4x128xf32, #tpu.memory_space<vmem>>, vector<4x128xf32>,
    %c0_8 = arith.constant 0 : index
    %c0_9 = arith.constant 0 : index
    %6 = vector.load %arg5[%c0_8, %c0_9] : memref<4x128xf32, #tpu.memory_space<vmem>>, vector<4x128xf32>
    tpu.vector_store %arg5[%c0_8, %c0_9], %4 {strides = array<i32>} : memref<4x128xf32, #tpu.memory_space<vmem>>, vector<4x128xf32>,
    return
  }
  func.func @transform_0(%arg0: i32) -> (i32, i32) {
    %c0_i32 = arith.constant 0 : i32
    %c0_i32_0 = arith.constant 0 : i32
    return %arg0, %c0_i32 : i32, i32
  }
  func.func @transform_1(%arg0: i32) -> (i32, i32) {
    %c0_i32 = arith.constant 0 : i32
    %c0_i32_0 = arith.constant 0 : i32
    %c0_i32_1 = arith.constant 0 : i32
    return %c0_i32, %c0_i32_0 : i32, i32
  }
  func.func @transform_2(%arg0: i32) -> (i32, i32) {
    %c0_i32 = arith.constant 0 : i32
    %c0_i32_0 = arith.constant 0 : i32
    %c0_i32_1 = arith.constant 0 : i32
    return %c0_i32, %c0_i32_0 : i32, i32
  }
  func.func @transform_3(%arg0: i32) -> (i32, i32) {
    %c0_i32 = arith.constant 0 : i32
    %c0_i32_0 = arith.constant 0 : i32
    return %arg0, %c0_i32 : i32, i32
  }
  func.func @transform_4(%arg0: i32) -> (i32, i32) {
    %c0_i32 = arith.constant 0 : i32
    %c0_i32_0 = arith.constant 0 : i32
    return %arg0, %c0_i32 : i32, i32
  }
}

</mosaic_0001>

<bundles_post_ra>
// kernel: tpu_custom_call.1
= control target key start
LH: loop header
LB: loop body
LE: loop exit
PB: predicated region body
PF: predicated region fallthrough
CT: control target
= control target key end

     0   :  { %10 = vsyncpa [#allocation3], 0  ;;  %s829_s0 = inlined_call_operand.hbm [shape: f32[4,512], index: 0, kind: input, shape index: {}]   ;;  %s830_s1 = inlined_call_operand.hbm [shape: f32[512,128], index: 1, kind: input, shape index: {}]   ;;  %s831_s2 = inlined_call_operand.hbm [shape: f32[512,128], index: 2, kind: input, shape index: {}]   ;;  %s832_s3 = inlined_call_operand.hbm [shape: f32[4,128], index: 3, kind: output, shape index: {0}]   ;;  %s833_s4 = inlined_call_operand.hbm [shape: f32[4,128], index: 4, kind: output, shape index: {1}]  }
   0x1   :  { %11 = vsyncpa [#allocation6], 0 }
   0x2   :  { %12 = vsyncpa [#allocation4], 0 }
   0x3   :  { %13 = vsyncpa [#allocation10], 0  ;;  %s762_s15 = smov [#allocation5]  }
   0x4   :  { %s29_s16 = sshll.u32 %s762_s15, 4  ;;  %s30_s16 = int_to_ptr.vmem [resolvable:$true] %s29_s16 }
   0x5   :  { %s662_s17 = scalar_lea.vmem %s30_s16, 8192  ;;  %p667_p1 = scmp.lt.s32.totalorder %s30_s16, %s30_s16 }
   0x6   :  { %p663_p0 = scmp.ne.s32.totalorder %s30_s16, %s662_s17  ;;  %p668_p2 = scmp.lt.s32.totalorder %s662_s17, %s662_s17 }
   0x8   :  { %p669_p3 = por %p668_p2, %p667_p1 }
   0xa   :  { %p670_p4 = pnand %p669_p3, %p663_p0 }
   0xc   :  { %673 = shalt.err (!%p670_p4)
}
   0xd   :  { %s763_s18 = smov 128   ;;  %s764_s19 = smov 8  }
   0xe   :  { %35 = dma.hbm_to_vmem [thread:$0]  %s830_s1, 8192, %s30_s16, [#allocation6], %s763_s18, %s763_s18, %s764_s19  }
   0xf   :  { %s765_s22 = smov [#allocation2]   ;;  %s766_s24 = smov [#allocation7]  }
  0x10   :  { %s20_s23 = sshll.u32 %s765_s22, 4  ;;  %s41_s25 = sshll.u32 %s766_s24, 4  ;;  %s21_s23 = int_to_ptr.vmem [resolvable:$true] %s20_s23  ;;  %s42_s25 = int_to_ptr.vmem [resolvable:$true] %s41_s25 }
  0x11   :  { %s682_s26 = scalar_lea.vmem %s21_s23, 256  ;;  %p687_p6 = scmp.lt.s32.totalorder %s21_s23, %s21_s23 }
  0x12   :  { %p683_p5 = scmp.ne.s32.totalorder %s21_s23, %s682_s26  ;;  %p688_p7 = scmp.lt.s32.totalorder %s682_s26, %s682_s26 }
  0x14   :  { %p689_p8 = por %p688_p7, %p687_p6 }
  0x16   :  { %p690_p9 = pnand %p689_p8, %p683_p5 }
  0x18   :  { %693 = shalt.err (!%p690_p9)
}
  0x19   :  { %23 = dma.hbm_to_vmem [thread:$0]  %s829_s0, 256, %s21_s23, [#allocation3]  }
  0x1a   :  { %s702_s29 = scalar_lea.vmem %s42_s25, 8192  ;;  %p707_p11 = scmp.lt.s32.totalorder %s42_s25, %s42_s25 }
  0x1b   :  { %p703_p10 = scmp.ne.s32.totalorder %s42_s25, %s702_s29  ;;  %p708_p12 = scmp.lt.s32.totalorder %s702_s29, %s702_s29 }
  0x1d   :  { %p709_p13 = por %p708_p12, %p707_p11 }
  0x1f   :  { %p710_p0 = pnand %p709_p13, %p703_p10 }
  0x21   :  { %713 = shalt.err (!%p710_p0)
}
  0x22   :  { %47 = dma.hbm_to_vmem [thread:$0]  %s831_s2, 8192, %s42_s25, [#allocation6], %s763_s18, %s763_s18, %s764_s19  }
  0x23   :  { %754 = dma.done.wait [#allocation3], 256  }
  0x24   :  { %755 = vsyncadd [#allocation3], 4294967040 }
  0x25   :  { %756 = dma.done.wait [#allocation6], 16384  }
  0x26   :  { %757 = vsyncadd [#allocation6], 4294950912  ;;  %v90_v0 = vld [vmem:[#allocation5 + $0xf8] sm:$0xff]  ;;  %v89_v4 = vld [vmem:[#allocation5 + $0xf0] sm:$0xff]  ;;  %s767_s0 = smov [#allocation8]  }
  0x27   :  { %v122_v1 = vld [vmem:[#allocation5 + $0x1f8] sm:$0xff]  ;;  %505 = vmatprep.subr.mxu0 %v90_v0  ;;  %v121_v5 = vld [vmem:[#allocation5 + $0x1f0] sm:$0xff]  ;;  %v88_v8 = vld [vmem:[#allocation5 + $0xe8] sm:$0xff]  ;;  %s481_s2 = sshll.u32 %s767_s0, 4  ;;  %s482_s2 = int_to_ptr.vmem [resolvable:$true] %s481_s2 }
  0x28   :  { %v74_v2 = vld [vmem:[#allocation5 + $0x78] sm:$0xff]  ;;  %540 = vmatprep.subr.mxu1 %v122_v1  ;;  %v73_v6 = vld [vmem:[#allocation5 + $0x70] sm:$0xff]  ;;  %v120_v9 = vld [vmem:[#allocation5 + $0x1e8] sm:$0xff]  ;;  %s714_s5 = scalar_lea.vmem %s482_s2, 64  ;;  %p719_p2 = scmp.lt.s32.totalorder %s482_s2, %s482_s2 }
  0x29   :  { %v106_v3 = vld [vmem:[#allocation5 + $0x178] sm:$0xff]  ;;  %506 = vmatpush3.msra.mxu0 %v74_v2  ;;  %v105_v7 = vld [vmem:[#allocation5 + $0x170] sm:$0xff]  ;;  %v72_v10 = vld [vmem:[#allocation5 + $0x68] sm:$0xff]  ;;  %p715_p1 = scmp.ne.s32.totalorder %s482_s2, %s714_s5  ;;  %p720_p3 = scmp.lt.s32.totalorder %s714_s5, %s714_s5 }
  0x2a   :  { %541 = vmatpush3.msra.mxu1 %v106_v3  ;;  %507 = vmatprep.subr.mxu0 %v89_v4  ;;  %v104_v11 = vld [vmem:[#allocation5 + $0x168] sm:$0xff]  ;;  %v87_v12 = vld [vmem:[#allocation5 + $0xe0] sm:$0xff]  ;;  %v86_v16 = vld [vmem:[#allocation5 + $0xd8] sm:$0xff] }
  0x2b   :  { %542 = vmatprep.subr.mxu1 %v121_v5  ;;  %508 = vmatpush3.msra.mxu0 %v73_v6  ;;  %v119_v13 = vld [vmem:[#allocation5 + $0x1e0] sm:$0xff]  ;;  %v118_v17 = vld [vmem:[#allocation5 + $0x1d8] sm:$0xff]  ;;  %v85_v20 = vld [vmem:[#allocation5 + $0xd0] sm:$0xff]  ;;  %p721_p4 = por %p720_p3, %p719_p2 }
  0x2c   :  { %543 = vmatpush3.msra.mxu1 %v105_v7  ;;  %509 = vmatprep.subr.mxu0 %v88_v8  ;;  %v71_v14 = vld [vmem:[#allocation5 + $0x60] sm:$0xff]  ;;  %v70_v18 = vld [vmem:[#allocation5 + $0x58] sm:$0xff]  ;;  %v117_v21 = vld [vmem:[#allocation5 + $0x1d0] sm:$0xff] }
  0x2d   :  { %544 = vmatprep.subr.mxu1 %v120_v9  ;;  %v103_v15 = vld [vmem:[#allocation5 + $0x160] sm:$0xff]  ;;  %510 = vmatpush3.msra.mxu0 %v72_v10  ;;  %v102_v19 = vld [vmem:[#allocation5 + $0x158] sm:$0xff]  ;;  %v69_v22 = vld [vmem:[#allocation5 + $0x50] sm:$0xff]  ;;  %p722_p5 = pnand %p721_p4, %p715_p1 }
  0x2e   :  { %545 = vmatpush3.msra.mxu1 %v104_v11  ;;  %511 = vmatprep.subr.mxu0 %v87_v12  ;;  %v101_v23 = vld [vmem:[#allocation5 + $0x150] sm:$0xff]  ;;  %v84_v24 = vld [vmem:[#allocation5 + $0xc8] sm:$0xff]  ;;  %v83_v28 = vld [vmem:[#allocation5 + $0xc0] sm:$0xff] }
  0x2f   :  { %546 = vmatprep.subr.mxu1 %v119_v13  ;;  %512 = vmatpush3.msra.mxu0 %v71_v14  ;;  %v116_v25 = vld [vmem:[#allocation5 + $0x1c8] sm:$0xff]  ;;  %v115_v29 = vld [vmem:[#allocation5 + $0x1c0] sm:$0xff]  ;;  %v82_v32 = vld [vmem:[#allocation5 + $0xb8] sm:$0xff] }
  0x30   :  { %547 = vmatpush3.msra.mxu1 %v103_v15  ;;  %513 = vmatprep.subr.mxu0 %v86_v16  ;;  %v68_v26 = vld [vmem:[#allocation5 + $0x48] sm:$0xff]  ;;  %v67_v30 = vld [vmem:[#allocation5 + $0x40] sm:$0xff]  ;;  %v114_v33 = vld [vmem:[#allocation5 + $0x1b8] sm:$0xff] }
  0x31   :  { %548 = vmatprep.subr.mxu1 %v118_v17  ;;  %514 = vmatpush3.msra.mxu0 %v70_v18  ;;  %v100_v27 = vld [vmem:[#allocation5 + $0x148] sm:$0xff]  ;;  %v99_v31 = vld [vmem:[#allocation5 + $0x140] sm:$0xff]  ;;  %v66_v34 = vld [vmem:[#allocation5 + $0x38] sm:$0xff] }
  0x32   :  { %549 = vmatpush3.msra.mxu1 %v102_v19  ;;  %515 = vmatprep.subr.mxu0 %v85_v20  ;;  %v98_v35 = vld [vmem:[#allocation5 + $0x138] sm:$0xff]  ;;  %v81_v36 = vld [vmem:[#allocation5 + $0xb0] sm:$0xff]  ;;  %v80_v40 = vld [vmem:[#allocation5 + $0xa8] sm:$0xff] }
  0x33   :  { %550 = vmatprep.subr.mxu1 %v117_v21  ;;  %516 = vmatpush3.msra.mxu0 %v69_v22  ;;  %v113_v37 = vld [vmem:[#allocation5 + $0x1b0] sm:$0xff]  ;;  %v112_v41 = vld [vmem:[#allocation5 + $0x1a8] sm:$0xff]  ;;  %v79_v44 = vld [vmem:[#allocation5 + $0xa0] sm:$0xff] }
  0x34   :  { %551 = vmatpush3.msra.mxu1 %v101_v23  ;;  %517 = vmatprep.subr.mxu0 %v84_v24  ;;  %v65_v38 = vld [vmem:[#allocation5 + $0x30] sm:$0xff]  ;;  %v64_v42 = vld [vmem:[#allocation5 + $0x28] sm:$0xff]  ;;  %v111_v45 = vld [vmem:[#allocation5 + $0x1a0] sm:$0xff] }
  0x35   :  { %552 = vmatprep.subr.mxu1 %v116_v25  ;;  %518 = vmatpush3.msra.mxu0 %v68_v26  ;;  %v97_v39 = vld [vmem:[#allocation5 + $0x130] sm:$0xff]  ;;  %v96_v43 = vld [vmem:[#allocation5 + $0x128] sm:$0xff]  ;;  %v63_v46 = vld [vmem:[#allocation5 + $0x20] sm:$0xff] }
  0x36   :  { %553 = vmatpush3.msra.mxu1 %v100_v27  ;;  %519 = vmatprep.subr.mxu0 %v83_v28  ;;  %v95_v47 = vld [vmem:[#allocation5 + $0x120] sm:$0xff]  ;;  %v78_v48 = vld [vmem:[#allocation5 + $0x98] sm:$0xff]  ;;  %v77_v52 = vld [vmem:[#allocation5 + $0x90] sm:$0xff] }
  0x37   :  { %554 = vmatprep.subr.mxu1 %v115_v29  ;;  %520 = vmatpush3.msra.mxu0 %v67_v30  ;;  %v110_v49 = vld [vmem:[#allocation5 + $0x198] sm:$0xff]  ;;  %v109_v53 = vld [vmem:[#allocation5 + $0x190] sm:$0xff]  ;;  %v76_v57 = vld [vmem:[#allocation5 + $0x88] sm:$0xff] }
  0x38   :  { %555 = vmatpush3.msra.mxu1 %v99_v31  ;;  %521 = vmatprep.subr.mxu0 %v82_v32  ;;  %v62_v50 = vld [vmem:[#allocation5 + $0x18] sm:$0xff]  ;;  %v61_v54 = vld [vmem:[#allocation5 + $0x10] sm:$0xff]  ;;  %v108_v58 = vld [vmem:[#allocation5 + $0x188] sm:$0xff] }
  0x39   :  { %556 = vmatprep.subr.mxu1 %v114_v33  ;;  %522 = vmatpush3.msra.mxu0 %v66_v34  ;;  %v94_v51 = vld [vmem:[#allocation5 + $0x118] sm:$0xff]  ;;  %v93_v55 = vld [vmem:[#allocation5 + $0x110] sm:$0xff]  ;;  %v60_v60 = vld [vmem:[#allocation5 + $0x8] sm:$0xff] }
  0x3a   :  { %557 = vmatpush3.msra.mxu1 %v98_v35  ;;  %523 = vmatprep.subr.mxu0 %v81_v36  ;;  %v803_v56 = vld [vmem:[#allocation2] sm:$0xff]  ;;  %v805_v59 = vld [vmem:[#allocation2 + $0x8] sm:$0xff]  ;;  %v92_v61 = vld [vmem:[#allocation5 + $0x108] sm:$0xff] }
  0x3b   :  { %558 = vmatprep.subr.mxu1 %v113_v37  ;;  %524 = vmatpush3.msra.mxu0 %v65_v38  ;;  %v75_v62 = vld [vmem:[#allocation5 + $0x80] sm:$0xff]  ;;  %v809_v0 = vcombine.high %v803_v56, %v803_v56  ;;  %v813_v2 = vcombine.high %v805_v59, %v805_v59  ;;  %v300_v4 = vld [vmem:[#allocation7 + $0xf8] sm:$0xff]  ;;  %v299_v8 = vld [vmem:[#allocation7 + $0xf0] sm:$0xff] }
  0x3c   :  { %559 = vmatpush3.msra.mxu1 %v97_v39  ;;  %525 = vmatprep.subr.mxu0 %v80_v40  ;;  %v107_v63 = vld [vmem:[#allocation5 + $0x180] sm:$0xff]  ;;  %v332_v5 = vld [vmem:[#allocation7 + $0x1f8] sm:$0xff]  ;;  %v331_v9 = vld [vmem:[#allocation7 + $0x1f0] sm:$0xff] }
  0x3d   :  { %560 = vmatprep.subr.mxu1 %v112_v41  ;;  %526 = vmatpush3.msra.mxu0 %v64_v42  ;;  %v59_v1 = vld [vmem:[#allocation5] sm:$0xff]  ;;  %v284_v6 = vld [vmem:[#allocation7 + $0x78] sm:$0xff]  ;;  %v283_v10 = vld [vmem:[#allocation7 + $0x70] sm:$0xff] }
  0x3e   :  { %561 = vmatpush3.msra.mxu1 %v96_v43  ;;  %527 = vmatprep.subr.mxu0 %v79_v44  ;;  %v91_v3 = vld [vmem:[#allocation5 + $0x100] sm:$0xff]  ;;  %v316_v7 = vld [vmem:[#allocation7 + $0x178] sm:$0xff]  ;;  %v315_v11 = vld [vmem:[#allocation7 + $0x170] sm:$0xff] }
  0x3f   :  { %562 = vmatprep.subr.mxu1 %v111_v45  ;;  %528 = vmatpush3.msra.mxu0 %v63_v46  ;;  %v298_v12 = vld [vmem:[#allocation7 + $0xe8] sm:$0xff]  ;;  %v297_v16 = vld [vmem:[#allocation7 + $0xe0] sm:$0xff]  ;;  %v296_v20 = vld [vmem:[#allocation7 + $0xd8] sm:$0xff] }
  0x40   :  { %563 = vmatpush3.msra.mxu1 %v95_v47  ;;  %529 = vmatprep.subr.mxu0 %v78_v48  ;;  %v330_v13 = vld [vmem:[#allocation7 + $0x1e8] sm:$0xff]  ;;  %v329_v17 = vld [vmem:[#allocation7 + $0x1e0] sm:$0xff]  ;;  %v328_v21 = vld [vmem:[#allocation7 + $0x1d8] sm:$0xff] }
  0x41   :  { %564 = vmatprep.subr.mxu1 %v110_v49  ;;  %530 = vmatpush3.msra.mxu0 %v62_v50  ;;  %v282_v14 = vld [vmem:[#allocation7 + $0x68] sm:$0xff]  ;;  %v281_v18 = vld [vmem:[#allocation7 + $0x60] sm:$0xff]  ;;  %v280_v22 = vld [vmem:[#allocation7 + $0x58] sm:$0xff] }
  0x42   :  { %565 = vmatpush3.msra.mxu1 %v94_v51  ;;  %531 = vmatprep.subr.mxu0 %v77_v52  ;;  %v314_v15 = vld [vmem:[#allocation7 + $0x168] sm:$0xff]  ;;  %v313_v19 = vld [vmem:[#allocation7 + $0x160] sm:$0xff]  ;;  %v312_v23 = vld [vmem:[#allocation7 + $0x158] sm:$0xff] }
  0x43   :  { %566 = vmatprep.subr.mxu1 %v109_v53  ;;  %532 = vmatpush3.msra.mxu0 %v61_v54  ;;  %v295_v24 = vld [vmem:[#allocation7 + $0xd0] sm:$0xff]  ;;  %v294_v28 = vld [vmem:[#allocation7 + $0xc8] sm:$0xff]  ;;  %v293_v32 = vld [vmem:[#allocation7 + $0xc0] sm:$0xff] }
  0x44   :  { %567 = vmatpush3.msra.mxu1 %v93_v55  ;;  %533 = vmatprep.subr.mxu0 %v76_v57  ;;  %v327_v25 = vld [vmem:[#allocation7 + $0x1d0] sm:$0xff]  ;;  %v326_v29 = vld [vmem:[#allocation7 + $0x1c8] sm:$0xff]  ;;  %v325_v33 = vld [vmem:[#allocation7 + $0x1c0] sm:$0xff] }
  0x45   :  { %568 = vmatprep.subr.mxu1 %v108_v58  ;;  %534 = vmatpush3.msra.mxu0 %v60_v60  ;;  %v279_v26 = vld [vmem:[#allocation7 + $0x50] sm:$0xff]  ;;  %v278_v30 = vld [vmem:[#allocation7 + $0x48] sm:$0xff]  ;;  %v277_v34 = vld [vmem:[#allocation7 + $0x40] sm:$0xff] }
  0x46   :  { %569 = vmatpush3.msra.mxu1 %v92_v61  ;;  %535 = vmatprep.subr.mxu0 %v75_v62  ;;  %v311_v27 = vld [vmem:[#allocation7 + $0x150] sm:$0xff]  ;;  %v310_v31 = vld [vmem:[#allocation7 + $0x148] sm:$0xff]  ;;  %v309_v35 = vld [vmem:[#allocation7 + $0x140] sm:$0xff] }
  0x47   :  { %570 = vmatprep.subr.mxu1 %v107_v63  ;;  %536 = vmatpush3.msra.mxu0 %v59_v1  ;;  %v292_v36 = vld [vmem:[#allocation7 + $0xb8] sm:$0xff]  ;;  %v291_v40 = vld [vmem:[#allocation7 + $0xb0] sm:$0xff]  ;;  %v290_v44 = vld [vmem:[#allocation7 + $0xa8] sm:$0xff] }
  0x48   :  { %193 = vmatprep.mubr.f32.mxu0 %v809_v0  ;;  %571 = vmatpush3.msra.mxu1 %v91_v3  ;;  %v324_v37 = vld [vmem:[#allocation7 + $0x1b8] sm:$0xff]  ;;  %v323_v41 = vld [vmem:[#allocation7 + $0x1b0] sm:$0xff]  ;;  %v322_v45 = vld [vmem:[#allocation7 + $0x1a8] sm:$0xff] }
  0x49   :  { %263 = vmatprep.mubr.f32.mxu1 %v813_v2  ;;  %194 = vmatmul.mubr.f32.vlgmr.msra.gmra.mxu0 %v803_v56  ;;  %v276_v38 = vld [vmem:[#allocation7 + $0x38] sm:$0xff]  ;;  %v275_v42 = vld [vmem:[#allocation7 + $0x30] sm:$0xff]  ;;  %v274_v46 = vld [vmem:[#allocation7 + $0x28] sm:$0xff] }
  0x4a   :  { %264 = vmatmul.mubr.f32.vlgmr.msra.gmra.mxu1 %v805_v59  ;;  %575 = vmatprep.subr.mxu0 %v300_v4  ;;  %v308_v39 = vld [vmem:[#allocation7 + $0x138] sm:$0xff]  ;;  %v307_v43 = vld [vmem:[#allocation7 + $0x130] sm:$0xff]  ;;  %v306_v47 = vld [vmem:[#allocation7 + $0x128] sm:$0xff] }
  0x4b   :  { %610 = vmatprep.subr.mxu1 %v332_v5  ;;  %576 = vmatpush3.msra.mxu0 %v284_v6  ;;  %v289_v48 = vld [vmem:[#allocation7 + $0xa0] sm:$0xff]  ;;  %v288_v52 = vld [vmem:[#allocation7 + $0x98] sm:$0xff]  ;;  %v287_v57 = vld [vmem:[#allocation7 + $0x90] sm:$0xff] }
  0x4c   :  { %611 = vmatpush3.msra.mxu1 %v316_v7  ;;  %577 = vmatprep.subr.mxu0 %v299_v8  ;;  %v321_v49 = vld [vmem:[#allocation7 + $0x1a0] sm:$0xff]  ;;  %v320_v53 = vld [vmem:[#allocation7 + $0x198] sm:$0xff]  ;;  %v319_v58 = vld [vmem:[#allocation7 + $0x190] sm:$0xff] }
  0x4d   :  { %612 = vmatprep.subr.mxu1 %v331_v9  ;;  %578 = vmatpush3.msra.mxu0 %v283_v10  ;;  %v273_v50 = vld [vmem:[#allocation7 + $0x20] sm:$0xff]  ;;  %v272_v54 = vld [vmem:[#allocation7 + $0x18] sm:$0xff]  ;;  %v271_v60 = vld [vmem:[#allocation7 + $0x10] sm:$0xff] }
  0x4e   :  { %613 = vmatpush3.msra.mxu1 %v315_v11  ;;  %579 = vmatprep.subr.mxu0 %v298_v12  ;;  %v305_v51 = vld [vmem:[#allocation7 + $0x120] sm:$0xff]  ;;  %v304_v55 = vld [vmem:[#allocation7 + $0x118] sm:$0xff]  ;;  %v303_v61 = vld [vmem:[#allocation7 + $0x110] sm:$0xff] }
  0x4f   :  { %614 = vmatprep.subr.mxu1 %v330_v13  ;;  %580 = vmatpush3.msra.mxu0 %v282_v14  ;;  %v286_v62 = vld [vmem:[#allocation7 + $0x88] sm:$0xff]  ;;  %v285_v4 = vld [vmem:[#allocation7 + $0x80] sm:$0xff] }
  0x50   :  { %615 = vmatpush3.msra.mxu1 %v314_v15  ;;  %581 = vmatprep.subr.mxu0 %v297_v16  ;;  %v318_v63 = vld [vmem:[#allocation7 + $0x188] sm:$0xff]  ;;  %v317_v5 = vld [vmem:[#allocation7 + $0x180] sm:$0xff] }
  0x51   :  { %616 = vmatprep.subr.mxu1 %v329_v17  ;;  %582 = vmatpush3.msra.mxu0 %v281_v18  ;;  %v270_v1 = vld [vmem:[#allocation7 + $0x8] sm:$0xff]  ;;  %v269_v6 = vld [vmem:[#allocation7] sm:$0xff] }
  0x52   :  { %617 = vmatpush3.msra.mxu1 %v313_v19  ;;  %583 = vmatprep.subr.mxu0 %v296_v20  ;;  %v302_v3 = vld [vmem:[#allocation7 + $0x108] sm:$0xff]  ;;  %v301_v7 = vld [vmem:[#allocation7 + $0x100] sm:$0xff] }
  0x53   :  { %618 = vmatprep.subr.mxu1 %v328_v21  ;;  %584 = vmatpush3.msra.mxu0 %v280_v22 }
  0x54   :  { %619 = vmatpush3.msra.mxu1 %v312_v23  ;;  %585 = vmatprep.subr.mxu0 %v295_v24 }
  0x55   :  { %620 = vmatprep.subr.mxu1 %v327_v25  ;;  %586 = vmatpush3.msra.mxu0 %v279_v26 }
  0x56   :  { %621 = vmatpush3.msra.mxu1 %v311_v27  ;;  %587 = vmatprep.subr.mxu0 %v294_v28 }
  0x57   :  { %622 = vmatprep.subr.mxu1 %v326_v29  ;;  %588 = vmatpush3.msra.mxu0 %v278_v30 }
  0x58   :  { %623 = vmatpush3.msra.mxu1 %v310_v31  ;;  %589 = vmatprep.subr.mxu0 %v293_v32 }
  0x59   :  { %624 = vmatprep.subr.mxu1 %v325_v33  ;;  %590 = vmatpush3.msra.mxu0 %v277_v34 }
  0x5a   :  { %625 = vmatpush3.msra.mxu1 %v309_v35  ;;  %591 = vmatprep.subr.mxu0 %v292_v36 }
  0x5b   :  { %626 = vmatprep.subr.mxu1 %v324_v37  ;;  %592 = vmatpush3.msra.mxu0 %v276_v38 }
  0x5c   :  { %627 = vmatpush3.msra.mxu1 %v308_v39  ;;  %593 = vmatprep.subr.mxu0 %v291_v40 }
  0x5d   :  { %628 = vmatprep.subr.mxu1 %v323_v41  ;;  %594 = vmatpush3.msra.mxu0 %v275_v42 }
  0x5e   :  { %629 = vmatpush3.msra.mxu1 %v307_v43  ;;  %595 = vmatprep.subr.mxu0 %v290_v44 }
  0x5f   :  { %630 = vmatprep.subr.mxu1 %v322_v45  ;;  %596 = vmatpush3.msra.mxu0 %v274_v46 }
  0x60   :  { %631 = vmatpush3.msra.mxu1 %v306_v47  ;;  %597 = vmatprep.subr.mxu0 %v289_v48 }
  0x61   :  { %632 = vmatprep.subr.mxu1 %v321_v49  ;;  %598 = vmatpush3.msra.mxu0 %v273_v50 }
  0x62   :  { %633 = vmatpush3.msra.mxu1 %v305_v51  ;;  %599 = vmatprep.subr.mxu0 %v288_v52 }
  0x63   :  { %634 = vmatprep.subr.mxu1 %v320_v53  ;;  %600 = vmatpush3.msra.mxu0 %v272_v54 }
  0x64   :  { %635 = vmatpush3.msra.mxu1 %v304_v55  ;;  %601 = vmatprep.subr.mxu0 %v287_v57 }
  0x65   :  { %636 = vmatprep.subr.mxu1 %v319_v58  ;;  %602 = vmatpush3.msra.mxu0 %v271_v60 }
  0x66   :  { %637 = vmatpush3.msra.mxu1 %v303_v61  ;;  %603 = vmatprep.subr.mxu0 %v286_v62 }
  0x67   :  { %638 = vmatprep.subr.mxu1 %v318_v63  ;;  %604 = vmatpush3.msra.mxu0 %v270_v1 }
  0x68   :  { %639 = vmatpush3.msra.mxu1 %v302_v3  ;;  %605 = vmatprep.subr.mxu0 %v285_v4 }
  0x69   :  { %640 = vmatprep.subr.mxu1 %v317_v5  ;;  %606 = vmatpush3.msra.mxu0 %v269_v6 }
  0x6a   :  { %397 = vmatprep.mubr.f32.mxu0 %v809_v0  ;;  %641 = vmatpush3.msra.mxu1 %v301_v7 }
  0x6b   :  { %467 = vmatprep.mubr.f32.mxu1 %v813_v2  ;;  %398 = vmatmul.mubr.f32.vlgmr.msra.gmra.mxu0 %v803_v56 }
  0x6c   :  { %468 = vmatmul.mubr.f32.vlgmr.msra.gmra.mxu1 %v805_v59 }
 0x109   :  { %v537_v8 = vpop.f32.mrf.mxu0 }
 0x10a   :  { %v572_v9 = vpop.f32.mrf.mxu1 }
 0x10b   :  { %v538_v10 = vpop.f32.mrf.mxu0 }
 0x10c   :  { %v573_v11 = vpop.f32.mrf.mxu1  ;;  %v539_v12 = vadd.f32 %v538_v10, %v537_v8 }
 0x10d   :  { %v574_v13 = vadd.f32 %v573_v11, %v572_v9 }
 0x10f   :  { %v266_v14 = vadd.f32 %v574_v13, %v539_v12 }
 0x111   :  { %473 = vst [vmem:[#allocation8] sm:$0xf] %v266_v14 }
 0x112   :  { %725 = shalt.err (!%p722_p5)
}
 0x113   :  { %484 = dma.vmem_to_hbm [thread:$0]  %s482_s2, 64, %s832_s3, [#allocation4]  }
 0x114   :  { %s768_s8 = smov [#allocation9]  }
 0x115   :  { %s491_s9 = sshll.u32 %s768_s8, 4  ;;  %s492_s9 = int_to_ptr.vmem [resolvable:$true] %s491_s9 }
 0x116   :  { %s734_s10 = scalar_lea.vmem %s492_s9, 64  ;;  %p739_p7 = scmp.lt.s32.totalorder %s492_s9, %s492_s9 }
 0x117   :  { %p735_p6 = scmp.ne.s32.totalorder %s492_s9, %s734_s10  ;;  %p740_p8 = scmp.lt.s32.totalorder %s734_s10, %s734_s10 }
 0x119   :  { %p741_p9 = por %p740_p8, %p739_p7 }
 0x11b   :  { %p742_p10 = pnand %p741_p9, %p735_p6 }
 0x12b   :  { %v607_v56 = vpop.f32.mrf.mxu0 }
 0x12c   :  { %v642_v59 = vpop.f32.mrf.mxu1 }
 0x12d   :  { %v608_v0 = vpop.f32.mrf.mxu0 }
 0x12e   :  { %v643_v2 = vpop.f32.mrf.mxu1  ;;  %v609_v15 = vadd.f32 %v608_v0, %v607_v56 }
 0x12f   :  { %v644_v16 = vadd.f32 %v643_v2, %v642_v59 }
 0x131   :  { %v470_v17 = vadd.f32 %v644_v16, %v609_v15 }
 0x133   :  { %474 = vst [vmem:[#allocation9] sm:$0xf] %v470_v17 }
 0x134   :  { %745 = shalt.err (!%p742_p10)
}
 0x135   :  { %494 = dma.vmem_to_hbm [thread:$0]  %s492_s9, 64, %s833_s4, [#allocation10]  }
 0x136   :  { %758 = dma.done.wait [#allocation4], 64  }
 0x137   :  { %759 = vsyncadd [#allocation4], 4294967232 }
 0x138   :  { %760 = dma.done.wait [#allocation10], 64  }
 0x139   :  { %761 = vsyncadd [#allocation10], 4294967232 }
 0x13a   :  { %501 = vsyncpa [#allocation3], 1 }
 0x13b   :  { %502 = vsyncpa [#allocation6], 1 }
 0x13c   :  { %503 = vsyncpa [#allocation4], 1 }
 0x13d   :  { %504 = vsyncpa [#allocation10], 1 }

</bundles_post_ra>
